<compile_context>
chip_gen: v7x
topology: tpu7x:2x2x1
jax: 0.10.0
libtpu: 0.0.40
codegen_flags: <defaults>
</compile_context>

<pallas_src>
import jax
import jax.numpy as jnp
from jax import lax
from jax.experimental import pallas as pl


def _sdpa_kernel(x_ref, wqkv_ref, bqkv_ref, o_ref):
    """Single invocation: fused QKV projection + per-batch attention, all in VMEM."""
    B, S, D = o_ref.shape

    x = x_ref[...]                      # (B*S, D)
    wqkv = wqkv_ref[...]                # (D, 3D)   [wq*scale | wk | wv]
    bqkv = bqkv_ref[...]                # (1, 3D)   [bq*scale | bk | bv]

    # One wide MXU pass for all three projections.
    qkv = jnp.dot(x, wqkv, preferred_element_type=jnp.float32) + bqkv   # (B*S, 3D)

    # B is a small static constant -> fully unrolled; slices are tile-aligned
    # (row offsets are multiples of S=8, lane offsets are multiples of D=128).
    for b in range(B):
        rows = slice(b * S, (b + 1) * S)
        q = qkv[rows, 0:D]              # (S, D), score scale already folded in
        k = qkv[rows, D:2 * D]          # (S, D)
        v = qkv[rows, 2 * D:3 * D]      # (S, D)

        # q @ k^T without materializing a transpose: contract last dims directly.
        scores = lax.dot_general(
            q, k, (((1,), (1,)), ((), ())),
            preferred_element_type=jnp.float32)                         # (S, S)

        # Numerically stable softmax over the last axis.
        m = jnp.max(scores, axis=-1, keepdims=True)
        e = jnp.exp(scores - m)
        # EUP fast-reciprocal path (approx) -- otherwise-idle slot.
        inv = pl.reciprocal(jnp.sum(e, axis=-1, keepdims=True), approx=True)
        attn = e * inv

        weighted = jnp.dot(attn, v, preferred_element_type=jnp.float32)  # (S, D)
        o_ref[b] = weighted.astype(o_ref.dtype)


@jax.jit
def sdpa_forward(x, params):
    """x: (B, S, D) float32 -> (B, S, D) float32."""
    B, S, D = x.shape
    wq, bq, wk, bk, wv, bv = params

    scale = 1.0 / (D ** 0.5)
    # Fold the 1/sqrt(in_size) score scale into the Q projection and fuse Q/K/V
    # weights/biases into single lane-dense operands (done once at trace time).
    w_qkv = jnp.concatenate([wq * scale, wk, wv], axis=1)   # (D, 3D)
    b_qkv = jnp.concatenate([bq * scale, bk, bv], axis=1)   # (1, 3D)
    x_flat = x.reshape(B * S, D)

    # No grid / no BlockSpecs: whole arrays are placed in VMEM as single blocks
    # and the kernel body runs exactly once.
    return pl.pallas_call(
        _sdpa_kernel,
        out_shape=jax.ShapeDtypeStruct((B, S, D), x.dtype),
    )(x_flat, w_qkv, b_qkv)


def _init_params(key, in_size):
    """nn.Linear-style init U(-1/sqrt(in), 1/sqrt(in)); weights stored as (in, out)."""
    bound = 1.0 / (in_size ** 0.5)
    ks = jax.random.split(key, 6)

    def u(k, shape):
        return jax.random.uniform(k, shape, jnp.float32, -bound, bound)

    wq = u(ks[0], (in_size, in_size)); bq = u(ks[1], (1, in_size))
    wk = u(ks[2], (in_size, in_size)); bk = u(ks[3], (1, in_size))
    wv = u(ks[4], (in_size, in_size)); bv = u(ks[5], (1, in_size))
    return (wq, bq, wk, bk, wv, bv)


def _sdpa_reference(x, params):
    """Plain-JAX (exact f32) reference for correctness checking."""
    wq, bq, wk, bk, wv, bv = params
    D = x.shape[-1]
    q = x @ wq + bq
    k = x @ wk + bk
    v = x @ wv + bv
    scores = jnp.einsum("bsd,btd->bst", q, k) / (D ** 0.5)
    attn = jax.nn.softmax(scores, axis=-1)
    return jnp.einsum("bst,btd->bsd", attn, v)


if __name__ == "__main__":
    B, S, D = 2, 8, 128   # batch, seq, in_size (D=128 keeps everything lane-dense)
    key = jax.random.PRNGKey(0)
    kx, kp = jax.random.split(key)

    x = jax.random.normal(kx, (B, S, D), jnp.float32)
    params = _init_params(kp, D)

    out = jax.block_until_ready(sdpa_forward(x, params))
    ref = _sdpa_reference(x, params)

    assert out.shape == (B, S, D), out.shape
    assert out.dtype == jnp.float32
    # pl.reciprocal(approx=True) uses the hardware fast-reciprocal path, so the
    # tolerance vs the exact-f32 reference is loosened accordingly.
    assert jnp.allclose(out, ref, atol=2e-2, rtol=2e-2), float(jnp.max(jnp.abs(out - ref)))

    print("KERNEL_OK")
</pallas_src>

<mosaic_0001>
module attributes {stable_mosaic.version = 11 : i64} {
  func.func @_sdpa_kernel(%arg0: memref<16x128xf32, #tpu.memory_space<vmem>>, %arg1: memref<128x384xf32, #tpu.memory_space<vmem>>, %arg2: memref<1x384xf32, #tpu.memory_space<vmem>>, %arg3: memref<2x8x128xf32, #tpu.memory_space<vmem>>) attributes {dimension_semantics = [], scalar_prefetch = 0 : i64, scratch_operands = 0 : i64, tpu.core_type = #tpu.core_type<tc>} {
    %c0 = arith.constant 0 : index
    %c0_0 = arith.constant 0 : index
    %0 = vector.load %arg0[%c0, %c0_0] : memref<16x128xf32, #tpu.memory_space<vmem>>, vector<16x128xf32>
    %c0_1 = arith.constant 0 : index
    %c0_2 = arith.constant 0 : index
    %1 = vector.load %arg1[%c0_1, %c0_2] : memref<128x384xf32, #tpu.memory_space<vmem>>, vector<128x384xf32>
    %c0_3 = arith.constant 0 : index
    %c0_4 = arith.constant 0 : index
    %2 = vector.load %arg2[%c0_3, %c0_4] : memref<1x384xf32, #tpu.memory_space<vmem>>, vector<1x384xf32>
    %cst = arith.constant dense<0.000000e+00> : vector<16x384xf32>
    %3 = tpu.matmul %0, %1, %cst {dimension_numbers = #tpu.dot_dimension_numbers<[1], [0], [0], [1], [0, 0, 1, 1], [], []>} : vector<16x128xf32>, vector<128x384xf32>, vector<16x384xf32> -> vector<16x384xf32>
    %4 = vector.broadcast %2 : vector<1x384xf32> to vector<16x384xf32>
    %5 = arith.addf %3, %4 : vector<16x384xf32>
    %6 = vector.extract_strided_slice %5 {offsets = [0, 0], sizes = [8, 128], strides = [1, 1]} : vector<16x384xf32> to vector<8x128xf32>
    %7 = vector.extract_strided_slice %5 {offsets = [0, 128], sizes = [8, 128], strides = [1, 1]} : vector<16x384xf32> to vector<8x128xf32>
    %8 = vector.extract_strided_slice %5 {offsets = [0, 256], sizes = [8, 128], strides = [1, 1]} : vector<16x384xf32> to vector<8x128xf32>
    %cst_5 = arith.constant dense<0.000000e+00> : vector<8x8xf32>
    %9 = tpu.matmul %6, %7, %cst_5 {dimension_numbers = #tpu.dot_dimension_numbers<[1], [1], [0], [0], [0, 0, 1, 0], [], []>} : vector<8x128xf32>, vector<8x128xf32>, vector<8x8xf32> -> vector<8x8xf32>
    %cst_6 = arith.constant dense<0xFF800000> : vector<8xf32>
    %10 = vector.multi_reduction <maximumf>, %9, %cst_6 [1] : vector<8x8xf32> to vector<8xf32>
    %11 = vector.shape_cast %10 : vector<8xf32> to vector<8x1xf32>
    %12 = vector.broadcast %11 : vector<8x1xf32> to vector<8x8xf32>
    %13 = arith.subf %9, %12 : vector<8x8xf32>
    %14 = math.exp %13 : vector<8x8xf32>
    %cst_7 = arith.constant dense<0.000000e+00> : vector<8xf32>
    %15 = vector.multi_reduction <add>, %14, %cst_7 [1] : vector<8x8xf32> to vector<8xf32>
    %16 = vector.shape_cast %15 : vector<8xf32> to vector<8x1xf32>
    %17 = tpu.reciprocal %16 {approx = true} : vector<8x1xf32> -> vector<8x1xf32>
    %18 = vector.broadcast %17 : vector<8x1xf32> to vector<8x8xf32>
    %19 = arith.mulf %14, %18 : vector<8x8xf32>
    %cst_8 = arith.constant dense<0.000000e+00> : vector<8x128xf32>
    %20 = tpu.matmul %19, %8, %cst_8 {dimension_numbers = #tpu.dot_dimension_numbers<[1], [0], [0], [1], [0, 0, 1, 1], [], []>} : vector<8x8xf32>, vector<8x128xf32>, vector<8x128xf32> -> vector<8x128xf32>
    %c0_9 = arith.constant 0 : index
    %c0_10 = arith.constant 0 : index
    %c0_11 = arith.constant 0 : index
    %21 = vector.load %arg3[%c0_9, %c0_10, %c0_11] : memref<2x8x128xf32, #tpu.memory_space<vmem>>, vector<1x8x128xf32>
    %22 = vector.shape_cast %21 : vector<1x8x128xf32> to vector<8x128xf32>
    %23 = vector.shape_cast %20 : vector<8x128xf32> to vector<1x8x128xf32>
    tpu.vector_store %arg3[%c0_9, %c0_10, %c0_11], %23 {strides = array<i32>} : memref<2x8x128xf32, #tpu.memory_space<vmem>>, vector<1x8x128xf32>,
    %24 = vector.extract_strided_slice %5 {offsets = [8, 0], sizes = [8, 128], strides = [1, 1]} : vector<16x384xf32> to vector<8x128xf32>
    %25 = vector.extract_strided_slice %5 {offsets = [8, 128], sizes = [8, 128], strides = [1, 1]} : vector<16x384xf32> to vector<8x128xf32>
    %26 = vector.extract_strided_slice %5 {offsets = [8, 256], sizes = [8, 128], strides = [1, 1]} : vector<16x384xf32> to vector<8x128xf32>
    %cst_12 = arith.constant dense<0.000000e+00> : vector<8x8xf32>
    %27 = tpu.matmul %24, %25, %cst_12 {dimension_numbers = #tpu.dot_dimension_numbers<[1], [1], [0], [0], [0, 0, 1, 0], [], []>} : vector<8x128xf32>, vector<8x128xf32>, vector<8x8xf32> -> vector<8x8xf32>
    %cst_13 = arith.constant dense<0xFF800000> : vector<8xf32>
    %28 = vector.multi_reduction <maximumf>, %27, %cst_13 [1] : vector<8x8xf32> to vector<8xf32>
    %29 = vector.shape_cast %28 : vector<8xf32> to vector<8x1xf32>
    %30 = vector.broadcast %29 : vector<8x1xf32> to vector<8x8xf32>
    %31 = arith.subf %27, %30 : vector<8x8xf32>
    %32 = math.exp %31 : vector<8x8xf32>
    %cst_14 = arith.constant dense<0.000000e+00> : vector<8xf32>
    %33 = vector.multi_reduction <add>, %32, %cst_14 [1] : vector<8x8xf32> to vector<8xf32>
    %34 = vector.shape_cast %33 : vector<8xf32> to vector<8x1xf32>
    %35 = tpu.reciprocal %34 {approx = true} : vector<8x1xf32> -> vector<8x1xf32>
    %36 = vector.broadcast %35 : vector<8x1xf32> to vector<8x8xf32>
    %37 = arith.mulf %32, %36 : vector<8x8xf32>
    %cst_15 = arith.constant dense<0.000000e+00> : vector<8x128xf32>
    %38 = tpu.matmul %37, %26, %cst_15 {dimension_numbers = #tpu.dot_dimension_numbers<[1], [0], [0], [1], [0, 0, 1, 1], [], []>} : vector<8x8xf32>, vector<8x128xf32>, vector<8x128xf32> -> vector<8x128xf32>
    %c1 = arith.constant 1 : index
    %c0_16 = arith.constant 0 : index
    %c0_17 = arith.constant 0 : index
    %39 = vector.load %arg3[%c1, %c0_16, %c0_17] : memref<2x8x128xf32, #tpu.memory_space<vmem>>, vector<1x8x128xf32>
    %40 = vector.shape_cast %39 : vector<1x8x128xf32> to vector<8x128xf32>
    %41 = vector.shape_cast %38 : vector<8x128xf32> to vector<1x8x128xf32>
    tpu.vector_store %arg3[%c1, %c0_16, %c0_17], %41 {strides = array<i32>} : memref<2x8x128xf32, #tpu.memory_space<vmem>>, vector<1x8x128xf32>,
    return
  }
}

</mosaic_0001>

<bundles_post_ra>
// kernel: sdpa_forward.1
= control target key start
LH: loop header
LB: loop body
LE: loop exit
PB: predicated region body
PF: predicated region fallthrough
CT: control target
= control target key end

     0   :  { %v746_v7 = vmov 0.0   ;;  %s960_s0 = inlined_call_operand.vmem [shape: f32[16,128], index: 0, kind: input, shape index: {}]   ;;  %s961_s1 = inlined_call_operand.vmem [shape: f32[128,384], index: 1, kind: input, shape index: {}]   ;;  %s962_s2 = inlined_call_operand.vmem [shape: f32[1,384], index: 2, kind: input, shape index: {}]   ;;  %s963_s3 = inlined_call_operand.hbm [shape: f32[2,8,128], index: 3, kind: output, shape index: {}]  }
   0x1   :  { %v18_v0 = vld [vmem:[%s961_s1 + $0x8] sm:$0xff]  ;;  %v21_v1 = vld [vmem:[%s961_s1 + $0x20] sm:$0xff]  ;;  %v20_v4 = vld [vmem:[%s961_s1 + $0x18] sm:$0xff]  ;;  %146 = vmatprep.mubr.f32.mxu0 %v746_v7 }
   0x2   :  { %v17_v2 = vld [vmem:[%s961_s1] sm:$0xff]  ;;  %v645_v3 = vpack.c.bf16 %v21_v1, %v18_v0  ;;  %v24_v5 = vld [vmem:[%s961_s1 + $0x38] sm:$0xff]  ;;  %v27_v6 = vld [vmem:[%s961_s1 + $0x50] sm:$0xff] }
   0x3   :  { %v647_v8 = vpack.c.bf16 %v20_v4, %v17_v2  ;;  %v649_v9 = vpack.c.bf16 %v27_v6, %v24_v5  ;;  %v23_v10 = vld [vmem:[%s961_s1 + $0x30] sm:$0xff]  ;;  %v26_v11 = vld [vmem:[%s961_s1 + $0x48] sm:$0xff]  ;;  %v33_v13 = vld [vmem:[%s961_s1 + $0x80] sm:$0xff] }
   0x4   :  { %v30_v12 = vld [vmem:[%s961_s1 + $0x68] sm:$0xff]  ;;  %646 = vmatprep.subr.bf16.mxu0 %v645_v3  ;;  %v651_v14 = vpack.c.bf16 %v26_v11, %v23_v10  ;;  %v29_v16 = vld [vmem:[%s961_s1 + $0x60] sm:$0xff]  ;;  %v32_v17 = vld [vmem:[%s961_s1 + $0x78] sm:$0xff] }
   0x5   :  { %648 = vmatpush1.bf16.msra.mxu0 %v647_v8  ;;  %v653_v15 = vpack.c.bf16 %v33_v13, %v30_v12  ;;  %v36_v18 = vld [vmem:[%s961_s1 + $0x98] sm:$0xff]  ;;  %v39_v19 = vld [vmem:[%s961_s1 + $0xb0] sm:$0xff]  ;;  %v655_v20 = vpack.c.bf16 %v32_v17, %v29_v16  ;;  %v38_v23 = vld [vmem:[%s961_s1 + $0xa8] sm:$0xff] }
   0x6   :  { %650 = vmatprep.subr.bf16.mxu0 %v649_v9  ;;  %v657_v21 = vpack.c.bf16 %v39_v19, %v36_v18  ;;  %v35_v22 = vld [vmem:[%s961_s1 + $0x90] sm:$0xff]  ;;  %v42_v24 = vld [vmem:[%s961_s1 + $0xc8] sm:$0xff]  ;;  %v45_v25 = vld [vmem:[%s961_s1 + $0xe0] sm:$0xff] }
   0x7   :  { %v829_v26 = vld [vmem:[%s960_s0] sm:$0xff]  ;;  %v19_v27 = vld [vmem:[%s961_s1 + $0x10] sm:$0xff]  ;;  %v22_v28 = vld [vmem:[%s961_s1 + $0x28] sm:$0xff]  ;;  %v659_v29 = vpack.c.bf16 %v38_v23, %v35_v22  ;;  %v661_v34 = vpack.c.bf16 %v45_v25, %v42_v24 }
   0x8   :  { %622 = vmatprep.mubr.f32.mxu1 %v829_v26  ;;  %v41_v30 = vld [vmem:[%s961_s1 + $0xc0] sm:$0xff]  ;;  %v677_v31 = vpack.c.bf16 %v22_v28, %v19_v27  ;;  %v28_v33 = vld [vmem:[%s961_s1 + $0x58] sm:$0xff]  ;;  %v31_v37 = vld [vmem:[%s961_s1 + $0x70] sm:$0xff] }
   0x9   :  { %652 = vmatpush1.bf16.msra.mxu0 %v651_v14  ;;  %v25_v32 = vld [vmem:[%s961_s1 + $0x40] sm:$0xff]  ;;  %v44_v35 = vld [vmem:[%s961_s1 + $0xd8] sm:$0xff]  ;;  %v34_v38 = vld [vmem:[%s961_s1 + $0x88] sm:$0xff] }
   0xa   :  { %654 = vmatprep.subr.bf16.mxu0 %v653_v15  ;;  %v681_v36 = vpack.c.bf16 %v28_v33, %v25_v32  ;;  %v48_v39 = vld [vmem:[%s961_s1 + $0xf8] sm:$0xff]  ;;  %v51_v40 = vld [vmem:[%s961_s1 + $0x110] sm:$0xff]  ;;  %678 = vmatprep.subr.bf16.mxu1 %v677_v31  ;;  %v663_v41 = vpack.c.bf16 %v44_v35, %v41_v30  ;;  %v50_v43 = vld [vmem:[%s961_s1 + $0x108] sm:$0xff]  ;;  %v685_v44 = vpack.c.bf16 %v34_v38, %v31_v37 }
   0xb   :  { %680 = vmatpush3.bf16.msra.mxu1 %v677_v31  ;;  %v47_v42 = vld [vmem:[%s961_s1 + $0xf0] sm:$0xff]  ;;  %v665_v45 = vpack.c.bf16 %v51_v40, %v48_v39  ;;  %v37_v46 = vld [vmem:[%s961_s1 + $0xa0] sm:$0xff]  ;;  %v40_v47 = vld [vmem:[%s961_s1 + $0xb8] sm:$0xff] }
   0xc   :  { %682 = vmatprep.subr.bf16.mxu1 %v681_v36 }
   0xd   :  { %656 = vmatpush1.bf16.msra.mxu0 %v655_v20 }
   0xe   :  { %658 = vmatprep.subr.bf16.mxu0 %v657_v21 }
  0x11   :  { %660 = vmatpush1.bf16.msra.mxu0 %v659_v29 }
  0x12   :  { %662 = vmatprep.subr.bf16.mxu0 %v661_v34 }
  0x13   :  { %8 = vsyncpa [#allocation3], 0  ;;  %v54_v48 = vld [vmem:[%s961_s1 + $0x128] sm:$0xff]  ;;  %v57_v49 = vld [vmem:[%s961_s1 + $0x140] sm:$0xff]  ;;  %684 = vmatpush3.bf16.msra.mxu1 %v681_v36  ;;  %v667_v50 = vpack.c.bf16 %v50_v43, %v47_v42  ;;  %v689_v52 = vpack.c.bf16 %v40_v47, %v37_v46  ;;  %vm747_vm0 = vmmov 0   ;;  %v67_v12 = vlaneseq }
  0x14   :  { %v53_v51 = vld [vmem:[%s961_s1 + $0x120] sm:$0xff]  ;;  %686 = vmatprep.subr.bf16.mxu1 %v685_v44  ;;  %v669_v53 = vpack.c.bf16 %v57_v49, %v54_v48  ;;  %v56_v54 = vld [vmem:[%s961_s1 + $0x138] sm:$0xff]  ;;  %v43_v55 = vld [vmem:[%s961_s1 + $0xd0] sm:$0xff]  ;;  %vm304_vm1 = vcmask 64512  }
  0x15   :  { %664 = vmatpush1.bf16.msra.mxu0 %v663_v41  ;;  %v46_v56 = vld [vmem:[%s961_s1 + $0xe8] sm:$0xff]  ;;  %v60_v57 = vld [vmem:[%s961_s1 + $0x158] sm:$0xff]  ;;  %v63_v58 = vld [vmem:[%s961_s1 + $0x170] sm:$0xff]  ;;  %v671_v59 = vpack.c.bf16 %v56_v54, %v53_v51  ;;  %v68_v13 = vshrl.u32 %v67_v12, 7 }
  0x16   :  { %666 = vmatprep.subr.bf16.mxu0 %v665_v45  ;;  %v59_v60 = vld [vmem:[%s961_s1 + $0x150] sm:$0xff]  ;;  %v693_v61 = vpack.c.bf16 %v46_v56, %v43_v55  ;;  %v673_v62 = vpack.c.bf16 %v63_v58, %v60_v57  ;;  %v62_v63 = vld [vmem:[%s961_s1 + $0x168] sm:$0xff]  ;;  %v49_v0 = vld [vmem:[%s961_s1 + $0x100] sm:$0xff] }
  0x17   :  { %688 = vmatpush3.bf16.msra.mxu1 %v685_v44  ;;  %v52_v1 = vld [vmem:[%s961_s1 + $0x118] sm:$0xff]  ;;  %v675_v2 = vpack.c.bf16 %v62_v63, %v59_v60  ;;  %v55_v4 = vld [vmem:[%s961_s1 + $0x130] sm:$0xff]  ;;  %v58_v5 = vld [vmem:[%s961_s1 + $0x148] sm:$0xff]  ;;  %v73_v14 = vsub.s32 1, %v68_v13  ;;  %v69_v16 = vsub.s32 0, %v68_v13  ;;  %v77_v23 = vsub.s32 2, %v68_v13 }
  0x18   :  { %690 = vmatprep.subr.bf16.mxu1 %v689_v52  ;;  %v697_v3 = vpack.c.bf16 %v52_v1, %v49_v0  ;;  %v701_v6 = vpack.c.bf16 %v58_v5, %v55_v4  ;;  %v61_v8 = vld [vmem:[%s961_s1 + $0x160] sm:$0xff]  ;;  %v64_v9 = vld [vmem:[%s961_s1 + $0x178] sm:$0xff]  ;;  %v16_v10 = vld [vmem:[%s960_s0 + $0x8] sm:$0xff] }
  0x19   :  { %668 = vmatpush1.bf16.msra.mxu0 %v667_v50  ;;  %v705_v11 = vpack.c.bf16 %v64_v9, %v61_v8  ;;  %v65_v15 = vld [vmem:[%s962_s2] sm:$0x7]  ;;  %s748_s2 = smov [#allocation2]  }
  0x1a   :  { %670 = vmatprep.subr.bf16.mxu0 %v669_v53  ;;  %v74_v17 = vrot.slane %v65_v15, %v73_v14  ;;  %v70_v19 = vrot.slane %v65_v15, %v69_v16  ;;  %v78_v27 = vrot.slane %v65_v15, %v77_v23  ;;  %s551_s4 = sshll.u32 %s748_s2, 4  ;;  %s552_s4 = int_to_ptr.vmem [resolvable:$true] %s551_s4 }
  0x1b   :  { %692 = vmatpush3.bf16.msra.mxu1 %v689_v52  ;;  %s722_s5 = scalar_lea.vmem %s552_s4, 256  ;;  %p727_p1 = scmp.lt.s32.totalorder %s552_s4, %s552_s4 }
  0x1c   :  { %694 = vmatprep.subr.bf16.mxu1 %v693_v61  ;;  %p723_p0 = scmp.ne.s32.totalorder %s552_s4, %s722_s5  ;;  %p728_p2 = scmp.lt.s32.totalorder %s722_s5, %s722_s5 }
  0x1d   :  { %672 = vmatpush1.bf16.msra.mxu0 %v671_v59 }
  0x1e   :  { %674 = vmatprep.subr.bf16.mxu0 %v673_v62  ;;  %p729_p3 = por %p728_p2, %p727_p1 }
  0x1f   :  { %696 = vmatpush3.bf16.msra.mxu1 %v693_v61 }
  0x20   :  { %698 = vmatprep.subr.bf16.mxu1 %v697_v3  ;;  %p730_p4 = pnand %p729_p3, %p723_p0 }
  0x21   :  { %676 = vmatpush1.bf16.msra.mxu0 %v675_v2 }
  0x22   :  { %630 = vmatprep.subr.mxu0 %v746_v7 }
  0x23   :  { %700 = vmatpush3.bf16.msra.mxu1 %v697_v3 }
  0x24   :  { %147 = vmatmul.mubr.f32.vlgmr.msra.gmra.mrb[0].mxu0 %v829_v26  ;;  %702 = vmatprep.subr.bf16.mxu1 %v701_v6 }
  0x25   :  { %152 = vmatprep.mubr.f32.mxu0 %v746_v7 }
  0x27   :  { %704 = vmatpush3.bf16.msra.mxu1 %v701_v6 }
  0x28   :  { %153 = vmatmul.mubr.f32.gmra.mrb[2].mxu0 %v16_v10  ;;  %706 = vmatprep.subr.bf16.mxu1 %v705_v11 }
  0x29   :  { %632 = vmatprep.mubr.msk.f32.mxu0 %vm747_vm0, %v746_v7 }
  0x2b   :  { %708 = vmatpush3.bf16.msra.mxu1 %v705_v11 }
  0x2c   :  { %625 = vmatprep.subr.mxu1 %v746_v7 }
  0x2e   :  { %623 = vmatmul.mubr.f32.vlgmr.msra.gmra.mrb[0].mxu1 %v16_v10 }
  0x2f   :  { %627 = vmatprep.mubr.msk.f32.mxu1 %vm747_vm0, %v746_v7 }
  0xf7   :  { %v148_v18 = vpop.f32.mrb[0].mxu0 }
  0xf8   :  { %v150_v20 = vpop.f32.mrb[1].mxu0  ;;  %v149_v24 = vadd.f32 %v148_v18, %v70_v19 }
  0xf9   :  { %v151_v21 = vadd.f32 %v150_v20, %v74_v17 }
  0xfb   :  { %v154_v22 = vpop.f32.mrb[2].mxu0  ;;  %626 = vmatpush3.xpose.msra.mxu1 %v151_v21 }
  0xfc   :  { %v156_v25 = vpop.f32.mrb[3].mxu0  ;;  %635 = vmatprep.subr.mxu1 %v746_v7  ;;  %v155_v28 = vadd.f32 %v154_v22, %v70_v19 }
  0xfd   :  { %v157_v26 = vadd.f32 %v156_v25, %v74_v17 }
  0xfe   :  { %628 = vmatmul.mubr.f32.vlgmr.msra.gmra.mrb[2].mxu1 %v149_v24 }
  0xff   :  { %636 = vmatpush3.xpose.msra.mxu1 %v157_v26  ;;  %637 = vmatprep.mubr.msk.f32.mxu1 %vm747_vm0, %v746_v7 }
 0x101   :  { %v624_v29 = vpop.f32.mrb[0].mxu1 }
 0x102   :  { %638 = vmatmul.mubr.f32.vlgmr.msra.gmra.mrb[4].mxu1 %v155_v28  ;;  %v231_v30 = vadd.f32 %v624_v29, %v78_v27  ;;  %v225_v31 = vpop.f32.mrb[1].mxu1 }
 0x103   :  { %v226_v32 = vadd.f32 %v225_v31, %v78_v27 }
 0x105   :  { %631 = vmatpush3.msra.mxu0 %v226_v32 }
 0x106   :  { %640 = vmatprep.subr.mxu0 %v746_v7 }
 0x1d1   :  { %v300_v33 = vpop.f32.mrb[2].mxu1 }
 0x1d2   :  { %v629_v34 = vpop.f32.mrb[3].mxu1  ;;  %v305_v35 = vsel %vm304_vm1, %v300_v33, -inf }
 0x1d3   :  { %306 = vmax.xlane.f32.xlu0 %v305_v35 }
 0x1d5   :  { %v456_v36 = vpop.f32.mrb[4].mxu1 }
 0x1d6   :  { %v639_v37 = vpop.f32.mrb[5].mxu1  ;;  %v460_v38 = vsel %vm304_vm1, %v456_v36, -inf }
 0x1d7   :  { %461 = vmax.xlane.f32.xlu0 %v460_v38 }
 0x260   :  { %v307_v39 = vpop.xlane.xlu0 %306 }
 0x261   :  { %v308_v40 = vsub.f32 %v300_v33, %v307_v39 }
 0x263   :  { %v309_v41 = vmul.f32 1.442695, %v308_v40 }
 0x264   :  { %v462_v42 = vpop.xlane.xlu0 %461 }
 0x265   :  { %714 = vpow2.f32 %v309_v41  ;;  %v463_v43 = vsub.f32 %v456_v36, %v462_v42 }
 0x267   :  { %v464_v44 = vmul.f32 1.442695, %v463_v43 }
 0x269   :  { %716 = vpow2.f32 %v464_v44 }
 0x26f   :  { %v715_v45 = vpop.eup %714 }
 0x270   :  { %v311_v46 = vsel %vm304_vm1, %v715_v45, 0.0 }
 0x271   :  { %312 = vadd.xlane.f32.xlu1 %v311_v46 }
 0x273   :  { %v717_v47 = vpop.eup %716 }
 0x274   :  { %v466_v48 = vsel %vm304_vm1, %v717_v47, 0.0 }
 0x275   :  { %467 = vadd.xlane.f32.xlu1 %v466_v48 }
 0x2fe   :  { %v313_v49 = vpop.xlane.xlu1 %312 }
 0x2ff   :  { %718 = vrcp.f32 %v313_v49 }
 0x302   :  { %v468_v50 = vpop.xlane.xlu1 %467 }
 0x303   :  { %720 = vrcp.f32 %v468_v50 }
 0x309   :  { %v719_v51 = vpop.eup %718 }
 0x30a   :  { %v315_v52 = vmul.f32 %v719_v51, %v715_v45 }
 0x30c   :  { %633 = vmatmul.mubr.msk.f32.vlgmr.msra.gmra.mrb[4].mxu0 %vm304_vm1, %v315_v52 }
 0x30d   :  { %v721_v53 = vpop.eup %720  ;;  %641 = vmatpush3.msra.mxu0 %v231_v30  ;;  %642 = vmatprep.mubr.msk.f32.mxu0 %vm747_vm0, %v746_v7 }
 0x30e   :  { %v470_v54 = vmul.f32 %v721_v53, %v717_v47 }
 0x310   :  { %643 = vmatmul.mubr.msk.f32.vlgmr.msra.gmra.mrb[6].mxu0 %vm304_vm1, %v470_v54 }
 0x3df   :  { %v385_v55 = vpop.f32.mrb[4].mxu0 }
 0x3e0   :  { %389 = vst [vmem:[#allocation2] sm:$0xff] %v385_v55  ;;  %v634_v56 = vpop.f32.mrb[5].mxu0 }
 0x3e3   :  { %v540_v57 = vpop.f32.mrb[6].mxu0 }
 0x3e4   :  { %545 = vst [vmem:[#allocation2 + $0x8] sm:$0xff] %v540_v57  ;;  %v644_v58 = vpop.f32.mrb[7].mxu0 }
 0x3e5   :  { %733 = shalt.err (!%p730_p4)
}
 0x3e6   :  { %s734_s8 = scalar_lea.hbm %s963_s3, 256 }
 0x3e7   :  { %p735_p5 = scmp.ne.s32.totalorder %s963_s3, %s734_s8  ;;  %p738_p6 = scmp.lt.u32.totalorder %s734_s8, %s963_s3 }
 0x3e9   :  { %p740_p7 = pnand %p738_p6, %p735_p5 }
 0x3eb   :  { %743 = shalt.err (!%p740_p7)
}
 0x3ec   :  { %s749_s13 = smov 128   ;;  %s750_s14 = smov 8  }
 0x3ed   :  { %557 = dma.vmem_to_hbm [thread:$0]  %s552_s4, 256, %s963_s3, [#allocation3], %s749_s13, %s749_s13, %s750_s14  }
 0x3ee   :  { %744 = dma.done.wait [#allocation3], 256  }
 0x3ef   :  { %745 = vsyncadd [#allocation3], 4294967040 }
 0x3f0   :  { %561 = vsyncpa [#allocation3], 1 }

</bundles_post_ra>
